<compile_context>
chip_gen: v7x
topology: tpu7x:2x2x1
jax: 0.10.0
libtpu: 0.0.40
codegen_flags: <defaults>
</compile_context>

<pallas_src>
import math

import jax
import jax.numpy as jnp
from jax import lax
from jax.experimental import pallas as pl
from jax.experimental.pallas import tpu as pltpu

BN_EPS = 1e-5


def _pick_tile(n, candidates):
    """Largest preferred tile size that divides n, else the full axis."""
    for c in candidates:
        if n % c == 0:
            return c
    return n


def _padded_block_bytes(shape, dtype):
    s = list(shape)
    s[-1] = -(-s[-1] // 128) * 128
    if len(s) >= 2:
        s[-2] = -(-s[-2] // 8) * 8
    n = 1
    for d in s:
        n *= d
    return n * jnp.dtype(dtype).itemsize


def _vmem_limit_bytes(blocks, scratch_bytes=0):
    """Explicit scoped-VMEM budget: double-buffered blocks + scratch with
    headroom, clamped to a range safe on v5e/v6e (128 MiB) and v7x (64 MiB)."""
    total = scratch_bytes + sum(2 * _padded_block_bytes(s, d) for s, d in blocks)
    return int(min(max(4 * total, 8 << 20), 32 << 20))


# ---------------------------------------------------------------------------
# Kernel 1: masked BatchNorm1d statistics (pass 1 of the two-pass BN).
# Accumulates sum(y*mask), sum(y^2*mask) and count per cloud, where
# y = linear(pc).  grid = (cloud, batch, point_tile); the cloud axis is
# "parallel" (megacore), (batch, point_tile) are the reduction axes.
# ---------------------------------------------------------------------------
def _bn_stats_kernel(pcm_ref, wt_ref, b_ref, stats_ref, acc_ref):
    # pcm_ref:   (1, 1, 4, TILE_N)  rows 0..2 = xyz, row 3 = mask
    # wt_ref:    (C, 3)  linear weight (out, in) ; b_ref: (C, 1) bias
    # stats_ref: (1, C, 128) col0 = sum(y*m), col1 = sum(y^2*m), col2 = count
    first = (pl.program_id(1) == 0) & (pl.program_id(2) == 0)

    @pl.when(first)
    def _init():
        acc_ref[...] = jnp.zeros_like(acc_ref)

    x = pcm_ref[0, 0]                    # (4, TILE_N)
    wt = wt_ref[...]                     # (C, 3)
    mask = x[3:4, :]                     # (1, TILE_N)
    # 3 -> 64 linear as VPU FMAs (K=3 would waste the MXU anyway).
    y = (b_ref[...]
         + wt[:, 0:1] * x[0:1, :]
         + wt[:, 1:2] * x[1:2, :]
         + wt[:, 2:3] * x[2:3, :])       # (C, TILE_N)
    ym = y * mask
    acc_ref[:, 0:1] += jnp.sum(ym, axis=1, keepdims=True)
    acc_ref[:, 1:2] += jnp.sum(ym * y, axis=1, keepdims=True)
    acc_ref[:, 2:3] += jnp.sum(mask, axis=1, keepdims=True)

    last = ((pl.program_id(1) == pl.num_programs(1) - 1)
            & (pl.program_id(2) == pl.num_programs(2) - 1))

    @pl.when(last)
    def _flush():
        stats_ref[0] = acc_ref[...]


def bn_masked_stats(pcm, wt, b_col):
    n_clouds, B, _, N = pcm.shape
    C = wt.shape[0]
    tile_n = _pick_tile(N, (4096, 2048, 1024, 512, 256, 128))
    blocks = [((1, 1, 4, tile_n), pcm.dtype),
              ((C, 3), wt.dtype),
              ((C, 1), b_col.dtype),
              ((1, C, 128), jnp.float32)]
    return pl.pallas_call(
        _bn_stats_kernel,
        out_shape=jax.ShapeDtypeStruct((n_clouds, C, 128), jnp.float32),
        grid=(n_clouds, B, N // tile_n),
        in_specs=[
            pl.BlockSpec((1, 1, 4, tile_n), lambda c, b, k: (c, b, 0, k)),
            pl.BlockSpec((C, 3), lambda c, b, k: (0, 0)),
            pl.BlockSpec((C, 1), lambda c, b, k: (0, 0)),
        ],
        out_specs=pl.BlockSpec((1, C, 128), lambda c, b, k: (c, 0, 0)),
        scratch_shapes=[pltpu.VMEM((C, 128), jnp.float32)],
        compiler_params=pltpu.CompilerParams(
            dimension_semantics=("parallel", "arbitrary", "arbitrary"),
            vmem_limit_bytes=_vmem_limit_bytes(blocks, scratch_bytes=C * 128 * 4),
        ),
    )(pcm, wt, b_col)


# ---------------------------------------------------------------------------
# Kernel 2: fused PointFeatureNet (linear + folded BN + ReLU + mask) and
# PillarFeatureNetScatter (scatter_add expressed as a one-hot MXU matmul):
#   out[b, cloud, c, p] = sum_n emb[c, n] * [idx[n] == p]
# grid = (cloud, batch, pillar_tile, point_tile); the point axis is the
# reduction axis, accumulated in a VMEM-resident (C, TILE_P) scratch.
# ---------------------------------------------------------------------------
def _fused_point_scatter_kernel(pcm_ref, w_ref, b_ref, idx_ref, out_ref, acc_ref):
    # pcm_ref: (1, 1, 4, TILE_N); w_ref: (1, C, 3); b_ref: (1, C, 1)
    # idx_ref: (1, 1, TILE_N, 1) int32 pillar index per point
    # out_ref: (1, 1, C, TILE_P); acc_ref: (C, TILE_P) f32
    j = pl.program_id(2)                 # pillar tile
    k = pl.program_id(3)                 # point tile (reduction axis)

    @pl.when(k == 0)
    def _init():
        acc_ref[...] = jnp.zeros_like(acc_ref)

    x = pcm_ref[0, 0]                    # (4, TILE_N)
    w = w_ref[0]                         # (C, 3) BN-folded weight
    mask = x[3:4, :]                     # (1, TILE_N)
    # Linear + folded BatchNorm on the VPU; keeps the MXU free for the
    # one-hot scatter matmul below.
    y = (b_ref[0]
         + w[:, 0:1] * x[0:1, :]
         + w[:, 1:2] * x[1:2, :]
         + w[:, 2:3] * x[2:3, :])        # (C, TILE_N)
    emb = (jnp.maximum(y, 0.0) * mask).astype(jnp.bfloat16)

    # idx comes in as a (TILE_N, 1) column so the one-hot is built directly in
    # the canonical (K, N) layout for the MXU (no in-kernel relayout); the
    # lane padding of this block is bounded (TILE_N x 512 B) by the tiling.
    idx = idx_ref[0, 0]                  # (TILE_N, 1)
    tile_n = x.shape[1]
    tile_p = acc_ref.shape[1]
    p_iota = lax.broadcasted_iota(jnp.int32, (tile_n, tile_p), 1) + j * tile_p
    onehot = (p_iota == idx).astype(jnp.bfloat16)          # exact in bf16
    acc_ref[...] += jnp.dot(emb, onehot, preferred_element_type=jnp.float32)

    @pl.when(k == pl.num_programs(3) - 1)
    def _flush():
        out_ref[0, 0] = acc_ref[...]


def fused_point_feature_scatter(pcm, w_eff, b_eff, idx, n_pillars_x, n_pillars_y):
    n_clouds, B, _, N = pcm.shape
    C = w_eff.shape[1]
    P = n_pillars_x * n_pillars_y
    tile_n = _pick_tile(N, (1024, 512, 256, 128))
    tile_p = _pick_tile(P, (512, 256, 128))
    blocks = [((1, 1, 4, tile_n), pcm.dtype),
              ((1, C, 3), w_eff.dtype),
              ((1, C, 1), b_eff.dtype),
              ((1, 1, tile_n, 1), idx.dtype),
              ((1, 1, C, tile_p), jnp.float32)]
    scratch_bytes = C * tile_p * 4 + tile_n * tile_p * 2 + C * tile_n * 6
    out = pl.pallas_call(
        _fused_point_scatter_kernel,
        out_shape=jax.ShapeDtypeStruct((B, n_clouds, C, P), jnp.float32),
        grid=(n_clouds, B, P // tile_p, N // tile_n),
        in_specs=[
            pl.BlockSpec((1, 1, 4, tile_n), lambda c, b, j, k: (c, b, 0, k)),
            pl.BlockSpec((1, C, 3), lambda c, b, j, k: (c, 0, 0)),
            pl.BlockSpec((1, C, 1), lambda c, b, j, k: (c, 0, 0)),
            pl.BlockSpec((1, 1, tile_n, 1), lambda c, b, j, k: (c, b, k, 0)),
        ],
        out_specs=pl.BlockSpec((1, 1, C, tile_p), lambda c, b, j, k: (b, c, 0, j)),
        scratch_shapes=[pltpu.VMEM((C, tile_p), jnp.float32)],
        compiler_params=pltpu.CompilerParams(
            dimension_semantics=("parallel", "parallel", "parallel", "arbitrary"),
            vmem_limit_bytes=_vmem_limit_bytes(blocks, scratch_bytes=scratch_bytes),
        ),
    )(pcm, w_eff, b_eff, idx)
    return out.reshape(B * n_clouds, C, n_pillars_x, n_pillars_y)


# ---------------------------------------------------------------------------
# Encoder wrapper
# ---------------------------------------------------------------------------
class EncoderPallas:
    def __init__(self, n_pillars_x=8, n_pillars_y=8, n_features=3,
                 out_features=64, key=None):
        if key is None:
            key = jax.random.PRNGKey(0)
        self.n_pillars_x = n_pillars_x
        self.n_pillars_y = n_pillars_y
        self.out_features = out_features
        kw, kb = jax.random.split(key)
        bound = 1.0 / math.sqrt(n_features)
        # torch.nn.Linear layout: weight (out, in), bias (out,)
        self.wt = jax.random.uniform(kw, (out_features, n_features),
                                     jnp.float32, -bound, bound)
        self.b = jax.random.uniform(kb, (out_features,),
                                    jnp.float32, -bound, bound)
        # BatchNorm1d default affine params
        self.gamma = jnp.ones((out_features,), jnp.float32)
        self.beta = jnp.zeros((out_features,), jnp.float32)

    def __call__(self, previous_pcl, previous_mask, previous_grid,
                 current_pcl, current_mask, current_grid):
        # Pack both clouds; fold the validity mask in as the 4th point channel
        # and lay the point axis out along lanes (channels-first).
        pc = jnp.stack([previous_pcl, current_pcl], axis=0).astype(jnp.float32)
        mask = jnp.stack([previous_mask, current_mask],
                         axis=0).astype(jnp.float32)
        pcm = jnp.concatenate([pc, mask[..., None]], axis=-1)   # (2, B, N, 4)
        pcm = jnp.transpose(pcm, (0, 1, 3, 2))                  # (2, B, 4, N)
        idx = jnp.stack([previous_grid, current_grid],
                        axis=0).astype(jnp.int32)[..., None]    # (2, B, N, 1)
        b_col = self.b[:, None]                                 # (C, 1)

        # Pass 1: masked BatchNorm1d statistics per cloud (training mode,
        # biased variance, stats over masked rows only).
        stats = bn_masked_stats(pcm, self.wt, b_col)            # (2, C, 128)
        s1 = stats[:, :, 0]
        s2 = stats[:, :, 1]
        cnt = stats[:, 0, 2]
        n = jnp.maximum(cnt, 1.0)[:, None]                      # (2, 1)
        mean = s1 / n
        var = jnp.maximum(s2 / n - mean * mean, 0.0)
        scale = self.gamma[None, :] * lax.rsqrt(var + BN_EPS)   # (2, C)
        shift = self.beta[None, :] - mean * scale
        # Fold BN into the linear: y_bn = (scale*W) x + (scale*b + shift)
        w_eff = scale[:, :, None] * self.wt[None, :, :]         # (2, C, 3)
        b_eff = (scale * self.b[None, :] + shift)[:, :, None]   # (2, C, 1)

        # Pass 2: fused linear+BN+ReLU+mask + pillar scatter_add.
        # TODO(synk): reference applies `.type(self.dtype)` where self.dtype
        # is undefined on the module; we keep float32 throughout.
        out = fused_point_feature_scatter(pcm, w_eff, b_eff, idx,
                                          self.n_pillars_x, self.n_pillars_y)
        # TODO(synk): the reference forward ends with `pass` (returns None);
        # we return the computed pillar embeddings instead.
        return out


# ---------------------------------------------------------------------------
# Pure-JAX reference (mirrors the PyTorch module, training-mode BN)
# ---------------------------------------------------------------------------
def _reference_forward(enc, previous_pcl, previous_mask, previous_grid,
                       current_pcl, current_mask, current_grid):
    def point_feature(pc, mask):
        B, N, F = pc.shape
        x = pc.reshape(B * N, F).astype(jnp.float32)
        m = mask.reshape(B * N).astype(jnp.float32)[:, None]
        y = x @ enc.wt.T + enc.b
        n = jnp.maximum(jnp.sum(m), 1.0)
        mu = jnp.sum(y * m, axis=0) / n
        var = jnp.sum(((y - mu) ** 2) * m, axis=0) / n
        normed = (y - mu) / jnp.sqrt(var + BN_EPS) * enc.gamma + enc.beta
        return (jnp.maximum(normed, 0.0) * m).reshape(B, N, -1)

    def scatter(emb, indices):
        P = enc.n_pillars_x * enc.n_pillars_y
        onehot = jax.nn.one_hot(indices, P, dtype=emb.dtype)    # (B, N, P)
        grid = jnp.einsum("bnc,bnp->bcp", emb, onehot)
        return grid.reshape(emb.shape[0], -1, enc.n_pillars_x, enc.n_pillars_y)

    prev = scatter(point_feature(previous_pcl, previous_mask), previous_grid)
    cur = scatter(point_feature(current_pcl, current_mask), current_grid)
    out = jnp.stack([prev, cur], axis=1)
    return out.reshape(-1, enc.out_features, enc.n_pillars_x, enc.n_pillars_y)


if __name__ == "__main__":
    B, N, F = 2, 16, 3
    NPX, NPY = 8, 8
    P = NPX * NPY

    key = jax.random.PRNGKey(0)
    k1, k2, k3, k4, k5, k6, kenc = jax.random.split(key, 7)

    previous_pcl = jax.random.normal(k1, (B, N, F), jnp.float32)
    current_pcl = jax.random.normal(k2, (B, N, F), jnp.float32)
    previous_mask = jax.random.bernoulli(k3, 0.8, (B, N))
    current_mask = jax.random.bernoulli(k4, 0.8, (B, N))
    # guarantee at least one valid point per cloud / batch element
    previous_mask = previous_mask.at[:, 0].set(True)
    current_mask = current_mask.at[:, 0].set(True)
    previous_grid = jax.random.randint(k5, (B, N), 0, P, jnp.int32)
    current_grid = jax.random.randint(k6, (B, N), 0, P, jnp.int32)

    enc = EncoderPallas(n_pillars_x=NPX, n_pillars_y=NPY, n_features=F,
                        key=kenc)
    out = enc(previous_pcl, previous_mask, previous_grid,
              current_pcl, current_mask, current_grid)
    out = jax.block_until_ready(out)
    assert out.shape == (B * 2, 64, NPX, NPY), out.shape

    ref = _reference_forward(enc, previous_pcl, previous_mask, previous_grid,
                             current_pcl, current_mask, current_grid)
    # bf16 scatter-matmul operands (f32 accumulation) -> small rounding slack.
    max_err = float(jnp.max(jnp.abs(out - ref)))
    assert jnp.allclose(out, ref, atol=5e-2, rtol=5e-2), max_err
    print("KERNEL_OK")
</pallas_src>

<mosaic_0001>
module attributes {stable_mosaic.version = 11 : i64} {
  func.func @_bn_stats_kernel(%arg0: i32, %arg1: i32, %arg2: i32, %arg3: memref<1x1x4x16xf32, #tpu.memory_space<vmem>>, %arg4: memref<64x3xf32, #tpu.memory_space<vmem>>, %arg5: memref<64x1xf32, #tpu.memory_space<vmem>>, %arg6: memref<1x64x128xf32, #tpu.memory_space<vmem>>, %arg7: memref<64x128xf32, #tpu.memory_space<vmem>>) attributes {dimension_semantics = [#tpu.dimension_semantics<parallel>, #tpu.dimension_semantics<arbitrary>, #tpu.dimension_semantics<arbitrary>], iteration_bounds = array<i64: 2, 2, 1>, scalar_prefetch = 0 : i64, scratch_operands = 1 : i64, tpu.core_type = #tpu.core_type<tc>, window_params = [{transform_indices = @transform_0, window_bounds = array<i64: 1, 1, 4, 16>}, {pipeline_mode = #tpu.pipeline_mode<synchronous>, transform_indices = @transform_1, window_bounds = array<i64: 64, 3>}, {pipeline_mode = #tpu.pipeline_mode<synchronous>, transform_indices = @transform_2, window_bounds = array<i64: 64, 1>}, {transform_indices = @transform_3, window_bounds = array<i64: 1, 64, 128>}]} {
    %c0_i32 = arith.constant 0 : i32
    %0 = arith.cmpi eq, %arg1, %c0_i32 : i32
    %c0_i32_0 = arith.constant 0 : i32
    %1 = arith.cmpi eq, %arg2, %c0_i32_0 : i32
    %2 = arith.andi %0, %1 : i1
    %3 = arith.extui %2 : i1 to i32
    %c0_i32_1 = arith.constant 0 : i32
    %4 = arith.cmpi ne, %3, %c0_i32_1 : i32
    scf.if %4 {
      %cst_23 = arith.constant 0.000000e+00 : f32
      %53 = vector.broadcast %cst_23 : f32 to vector<64x128xf32>
      %c0_24 = arith.constant 0 : index
      %c0_25 = arith.constant 0 : index
      %54 = vector.load %arg7[%c0_24, %c0_25] : memref<64x128xf32, #tpu.memory_space<vmem>>, vector<64x128xf32>
      tpu.vector_store %arg7[%c0_24, %c0_25], %53 {strides = array<i32>} : memref<64x128xf32, #tpu.memory_space<vmem>>, vector<64x128xf32>,
    } else {
    }
    %c0 = arith.constant 0 : index
    %c0_2 = arith.constant 0 : index
    %c0_3 = arith.constant 0 : index
    %c0_4 = arith.constant 0 : index
    %5 = vector.load %arg3[%c0, %c0_2, %c0_3, %c0_4] : memref<1x1x4x16xf32, #tpu.memory_space<vmem>>, vector<1x1x4x16xf32>
    %6 = vector.shape_cast %5 : vector<1x1x4x16xf32> to vector<4x16xf32>
    %c0_5 = arith.constant 0 : index
    %c0_6 = arith.constant 0 : index
    %7 = vector.load %arg4[%c0_5, %c0_6] : memref<64x3xf32, #tpu.memory_space<vmem>>, vector<64x3xf32>
    %8 = vector.extract_strided_slice %6 {offsets = [3, 0], sizes = [1, 16], strides = [1, 1]} : vector<4x16xf32> to vector<1x16xf32>
    %c0_7 = arith.constant 0 : index
    %c0_8 = arith.constant 0 : index
    %9 = vector.load %arg5[%c0_7, %c0_8] : memref<64x1xf32, #tpu.memory_space<vmem>>, vector<64x1xf32>
    %10 = vector.extract_strided_slice %7 {offsets = [0, 0], sizes = [64, 1], strides = [1, 1]} : vector<64x3xf32> to vector<64x1xf32>
    %11 = vector.extract_strided_slice %6 {offsets = [0, 0], sizes = [1, 16], strides = [1, 1]} : vector<4x16xf32> to vector<1x16xf32>
    %12 = vector.broadcast %10 : vector<64x1xf32> to vector<64x16xf32>
    %13 = vector.broadcast %11 : vector<1x16xf32> to vector<64x16xf32>
    %14 = arith.mulf %12, %13 : vector<64x16xf32>
    %15 = vector.broadcast %9 : vector<64x1xf32> to vector<64x16xf32>
    %16 = arith.addf %15, %14 : vector<64x16xf32>
    %17 = vector.extract_strided_slice %7 {offsets = [0, 1], sizes = [64, 1], strides = [1, 1]} : vector<64x3xf32> to vector<64x1xf32>
    %18 = vector.extract_strided_slice %6 {offsets = [1, 0], sizes = [1, 16], strides = [1, 1]} : vector<4x16xf32> to vector<1x16xf32>
    %19 = vector.broadcast %17 : vector<64x1xf32> to vector<64x16xf32>
    %20 = vector.broadcast %18 : vector<1x16xf32> to vector<64x16xf32>
    %21 = arith.mulf %19, %20 : vector<64x16xf32>
    %22 = arith.addf %16, %21 : vector<64x16xf32>
    %23 = vector.extract_strided_slice %7 {offsets = [0, 2], sizes = [64, 1], strides = [1, 1]} : vector<64x3xf32> to vector<64x1xf32>
    %24 = vector.extract_strided_slice %6 {offsets = [2, 0], sizes = [1, 16], strides = [1, 1]} : vector<4x16xf32> to vector<1x16xf32>
    %25 = vector.broadcast %23 : vector<64x1xf32> to vector<64x16xf32>
    %26 = vector.broadcast %24 : vector<1x16xf32> to vector<64x16xf32>
    %27 = arith.mulf %25, %26 : vector<64x16xf32>
    %28 = arith.addf %22, %27 : vector<64x16xf32>
    %29 = vector.broadcast %8 : vector<1x16xf32> to vector<64x16xf32>
    %30 = arith.mulf %28, %29 : vector<64x16xf32>
    %c0_9 = arith.constant 0 : index
    %c0_10 = arith.constant 0 : index
    %31 = vector.load %arg7[%c0_9, %c0_10] : memref<64x128xf32, #tpu.memory_space<vmem>>, vector<64x1xf32>
    %cst = arith.constant dense<0.000000e+00> : vector<64xf32>
    %32 = vector.multi_reduction <add>, %30, %cst [1] : vector<64x16xf32> to vector<64xf32>
    %33 = vector.shape_cast %32 : vector<64xf32> to vector<64x1xf32>
    %34 = arith.addf %31, %33 : vector<64x1xf32>
    %c0_11 = arith.constant 0 : index
    %c0_12 = arith.constant 0 : index
    %35 = vector.load %arg7[%c0_11, %c0_12] : memref<64x128xf32, #tpu.memory_space<vmem>>, vector<64x1xf32>
    tpu.vector_store %arg7[%c0_11, %c0_12], %34 {strides = array<i32>} : memref<64x128xf32, #tpu.memory_space<vmem>>, vector<64x1xf32>,
    %c0_13 = arith.constant 0 : index
    %c1 = arith.constant 1 : index
    %36 = vector.load %arg7[%c0_13, %c1] : memref<64x128xf32, #tpu.memory_space<vmem>>, vector<64x1xf32>
    %37 = arith.mulf %30, %28 : vector<64x16xf32>
    %cst_14 = arith.constant dense<0.000000e+00> : vector<64xf32>
    %38 = vector.multi_reduction <add>, %37, %cst_14 [1] : vector<64x16xf32> to vector<64xf32>
    %39 = vector.shape_cast %38 : vector<64xf32> to vector<64x1xf32>
    %40 = arith.addf %36, %39 : vector<64x1xf32>
    %c0_15 = arith.constant 0 : index
    %c1_16 = arith.constant 1 : index
    %41 = vector.load %arg7[%c0_15, %c1_16] : memref<64x128xf32, #tpu.memory_space<vmem>>, vector<64x1xf32>
    tpu.vector_store %arg7[%c0_15, %c1_16], %40 {strides = array<i32>} : memref<64x128xf32, #tpu.memory_space<vmem>>, vector<64x1xf32>,
    %c0_17 = arith.constant 0 : index
    %c2 = arith.constant 2 : index
    %42 = vector.load %arg7[%c0_17, %c2] : memref<64x128xf32, #tpu.memory_space<vmem>>, vector<64x1xf32>
    %cst_18 = arith.constant dense<0.000000e+00> : vector<1xf32>
    %43 = vector.multi_reduction <add>, %8, %cst_18 [1] : vector<1x16xf32> to vector<1xf32>
    %44 = vector.shape_cast %43 : vector<1xf32> to vector<1x1xf32>
    %45 = vector.broadcast %44 : vector<1x1xf32> to vector<64x1xf32>
    %46 = arith.addf %42, %45 : vector<64x1xf32>
    %c0_19 = arith.constant 0 : index
    %c2_20 = arith.constant 2 : index
    %47 = vector.load %arg7[%c0_19, %c2_20] : memref<64x128xf32, #tpu.memory_space<vmem>>, vector<64x1xf32>
    tpu.vector_store %arg7[%c0_19, %c2_20], %46 {strides = array<i32>} : memref<64x128xf32, #tpu.memory_space<vmem>>, vector<64x1xf32>,
    %c1_i32 = arith.constant 1 : i32
    %48 = arith.cmpi eq, %arg1, %c1_i32 : i32
    %c0_i32_21 = arith.constant 0 : i32
    %49 = arith.cmpi eq, %arg2, %c0_i32_21 : i32
    %50 = arith.andi %48, %49 : i1
    %51 = arith.extui %50 : i1 to i32
    %c0_i32_22 = arith.constant 0 : i32
    %52 = arith.cmpi ne, %51, %c0_i32_22 : i32
    scf.if %52 {
      %c0_23 = arith.constant 0 : index
      %c0_24 = arith.constant 0 : index
      %53 = vector.load %arg7[%c0_23, %c0_24] : memref<64x128xf32, #tpu.memory_space<vmem>>, vector<64x128xf32>
      %c0_25 = arith.constant 0 : index
      %c0_26 = arith.constant 0 : index
      %c0_27 = arith.constant 0 : index
      %54 = vector.load %arg6[%c0_25, %c0_26, %c0_27] : memref<1x64x128xf32, #tpu.memory_space<vmem>>, vector<1x64x128xf32>
      %55 = vector.shape_cast %54 : vector<1x64x128xf32> to vector<64x128xf32>
      %56 = vector.shape_cast %53 : vector<64x128xf32> to vector<1x64x128xf32>
      tpu.vector_store %arg6[%c0_25, %c0_26, %c0_27], %56 {strides = array<i32>} : memref<1x64x128xf32, #tpu.memory_space<vmem>>, vector<1x64x128xf32>,
    } else {
    }
    return
  }
  func.func @transform_0(%arg0: i32, %arg1: i32, %arg2: i32) -> (i32, i32, i32, i32) {
    %c0_i32 = arith.constant 0 : i32
    %c0_i32_0 = arith.constant 0 : i32
    return %arg0, %arg1, %c0_i32, %arg2 : i32, i32, i32, i32
  }
  func.func @transform_1(%arg0: i32, %arg1: i32, %arg2: i32) -> (i32, i32) {
    %c0_i32 = arith.constant 0 : i32
    %c0_i32_0 = arith.constant 0 : i32
    %c0_i32_1 = arith.constant 0 : i32
    return %c0_i32, %c0_i32_0 : i32, i32
  }
  func.func @transform_2(%arg0: i32, %arg1: i32, %arg2: i32) -> (i32, i32) {
    %c0_i32 = arith.constant 0 : i32
    %c0_i32_0 = arith.constant 0 : i32
    %c0_i32_1 = arith.constant 0 : i32
    return %c0_i32, %c0_i32_0 : i32, i32
  }
  func.func @transform_3(%arg0: i32, %arg1: i32, %arg2: i32) -> (i32, i32, i32) {
    %c0_i32 = arith.constant 0 : i32
    %c0_i32_0 = arith.constant 0 : i32
    %c0_i32_1 = arith.constant 0 : i32
    return %arg0, %c0_i32, %c0_i32_0 : i32, i32, i32
  }
}

</mosaic_0001>

<bundles_post_ra>
// kernel: tpu_custom_call.1
= control target key start
LH: loop header
LB: loop body
LE: loop exit
PB: predicated region body
PF: predicated region fallthrough
CT: control target
= control target key end

     0   :  { %8 = vsyncpa [#allocation4], 0  ;;  %s1254_s0 = inlined_call_operand.vmem [shape: f32[2,2,4,16], index: 0, kind: input, shape index: {}]   ;;  %s1255_s1 = inlined_call_operand.vmem [shape: f32[64,3], index: 1, kind: input, shape index: {}]   ;;  %s1256_s2 = inlined_call_operand.vmem [shape: f32[64,1], index: 2, kind: input, shape index: {}]   ;;  %s1257_s3 = inlined_call_operand.hbm [shape: f32[2,64,128], index: 3, kind: output, shape index: {}]  }
   0x1   :  { %10 = vsyncpa [#allocation4 + $0x1], 0  ;;  %s941_s12 = smov 0   ;;  %s943_s13 = smov 0  }
   0x2   :  { %s945_s14 = smov 0   ;;  %s947_s15 = smov 0  }
   0x3   :  { %s949_s16 = smov 0   ;;  %s951_s17 = smov 0  }
   0x4   :  { %s953_s18 = smov 0   ;;  %s955_s19 = smov 0  }
   0x5 LB: > { %s717_s20 = sadd.s32 4294967295, %s912_s19   ;;  %s718_s21 = sadd.s32 4294967294, %s912_s19   ;;  %s912_s19 = sphi %s955_s19, %s16_s19   ;;  %s908_s18 = sphi %s953_s18, %s1266_s18   ;;  %s904_s17 = sphi %s951_s17, %s1265_s17   ;;  %s900_s16 = sphi %s949_s16, %s1264_s16   ;;  %s896_s15 = sphi %s947_s15, %s1263_s15   ;;  %s892_s14 = sphi %s945_s14, %s1262_s14   ;;  %s888_s13 = sphi %s943_s13, %s1261_s13   ;;  %s884_s12 = sphi %s941_s12, %s1260_s12  }
   0x6   : > { %s31_s22 = sadd.s32 1, %s904_s17  ;;  %s35_s23 = sadd.s32 1, %s908_s18 }
   0x7   : > { %p33_p0 = scmp.ge.s32.totalorder %s31_s22, 2  ;;  %p124_p1 = scmp.ne.s32.totalorder %s892_s14, %s888_s13 }
   0x8   : > { %p125_p2 = scmp.eq.s32.totalorder %s717_s20, 3  ;;  %p130_p4 = scmp.ne.s32.totalorder %s888_s13, %s884_s12 }
   0x9   : > { %s1268_s22 = smov (%p33_p0, %s31_s22), 0  ;;  %s1270_s23 = smov (!%p33_p0, %s35_s23), %s908_s18 }
   0xa   : > { %p990_p3 = por %p125_p2, %p124_p1  ;;  %p37_p5 = scmp.ge.s32.totalorder %s1270_s23, 2 }
   0xb   : > { %p131_p6 = scmp.eq.s32.totalorder %s718_s21, 3  ;;  %p721_p7 = scmp.ge.s32.totalorder %s912_s19, 1 }
   0xc   : > { %p169_p8 = scmp.lt.s32.totalorder %s912_s19, 5  ;;  %s1272_s23 = smov (%p37_p5, %s1270_s23), 0 }
   0xd   : > { %p1000_p9 = por %p131_p6, %p130_p4  ;;  %s111_s26 = ssub.s32 %s908_s18, %s1272_s23 }
   0xe   : > { %p170_p10 = pnand %p721_p7, %p169_p8  ;;  %s114_s27 = sadd.s32 1, %s892_s14 }
   0xf   : > { %p112_p11 = scmp.eq.s32.totalorder %s111_s26, 0  ;;  %s196_s29 = sand.u32 (!%p170_p10), 1, %s888_s13  }
  0x10   : > { %173 = sbr.rel (%p170_p10) target bundleno = 439 (0x1b7), region = 32  ;;  %p199_p12 = scmp.lt.s32.totalorder (!%p170_p10), %s900_s16, 1 }
  0x11   : > { %s1008_s28 = scalar_select %p112_p11, %s892_s14, %s114_s27  }
  0x12   : > { %s722_s30 = sshll.u32 (!%p170_p10), %s196_s29, 6  ;;  %p201_p13 = scmp.lt.s32.totalorder (!%p170_p10), %s896_s15, 1 }
  0x13   : > { %p210_p0 = scmp.eq.s32.totalorder (!%p170_p10), %s896_s15, 0  ;;  %s1023_s20 = scalar_lea.vmem (!%p170_p10), [#allocation3], %s722_s30 }
  0x17   : > { %s200_s4 = scalar_select %p199_p12, %s900_s16, 1 }
  0x18   : > { %s202_s5 = scalar_select %p201_p13, %s896_s15, 1 }
  0x19   : > { %s723_s6 = sshll.u32 %s200_s4, 1  ;;  %215 = sbr.rel (!%p210_p0) target bundleno = 32 (0x20), region = 36  ;;  %v914_v0 = vmov (%p210_p0), 0.0  }
  0x1a   : > { %s207_s7 = sadd.s32 %s723_s6, %s202_s5  ;;  %216 = vst [vmem:[#allocation2] sm:$0xff] (%p210_p0), %v914_v0  ;;  %217 = vst [vmem:[#allocation2 + $0x8] sm:$0xff] (%p210_p0), %v914_v0 }
  0x1b   : > { %s724_s8 = sshll.u32 %s207_s7, 2  ;;  %218 = vst [vmem:[#allocation2 + $0x10] sm:$0xff] (%p210_p0), %v914_v0  ;;  %219 = vst [vmem:[#allocation2 + $0x18] sm:$0xff] (%p210_p0), %v914_v0 }
  0x1c   : > { %s1021_s11 = scalar_lea.vmem %s1254_s0, %s724_s8  ;;  %220 = vst [vmem:[#allocation2 + $0x20] sm:$0xff] (%p210_p0), %v914_v0  ;;  %221 = vst [vmem:[#allocation2 + $0x28] sm:$0xff] (%p210_p0), %v914_v0 }
  0x1d   : > { %222 = vst [vmem:[#allocation2 + $0x30] sm:$0xff] (%p210_p0), %v914_v0  ;;  %223 = vst [vmem:[#allocation2 + $0x38] sm:$0xff] (%p210_p0), %v914_v0 }
  0x20 PF: > { %v227_v1 = vld [vmem:[%s1255_s1 + $0x10] sm:$0xff]  ;;  %v225_v2 = vld [vmem:[%s1255_s1] sm:$0xff]  ;;  %v915_v3 = vmov 0   ;;  %v228_v4 = vld [vmem:[%s1255_s1 + $0x18] sm:$0xff]  ;;  %v916_v18 = vmov 1   ;;  %v917_v19 = vmov 2   ;;  %v281_v36 = vlaneseq }
  0x21   : > { %813 = vset.pattern.permute.xlu1 %v915_v3  ;;  %812 = vset.pattern.permute.xlu0 %v915_v3  ;;  %v226_v5 = vld [vmem:[%s1255_s1 + $0x8] sm:$0xff]  ;;  %v229_v7 = vld [vmem:[%s1255_s1 + $0x20] sm:$0xff]  ;;  %v232_v8 = vld [vmem:[%s1255_s1 + $0x38] sm:$0xff]  ;;  %vm465_vm0 = vcmask 130048   ;;  %vm572_vm1 = vcmask 125955   ;;  %p597_p1 = scmp.eq.s32.totalorder %s896_s15, 1 }
  0x22   : > { %253 = vperm.xlu1 %813, %v227_v1   ;;  %243 = vperm.xlu0 %812, %v225_v2   ;;  %v230_v6 = vld [vmem:[%s1255_s1 + $0x28] sm:$0xff]  ;;  %v231_v9 = vld [vmem:[%s1255_s1 + $0x30] sm:$0xff]  ;;  %v233_v11 = vld [vmem:[%s1256_s2] sm:$0xff]  ;;  %v1081_v39 = vshrl.u32 %v281_v36, 7  ;;  %vm498_vm2 = vcmask 7168   ;;  %vm555_vm3 = vcmask 15368  }
  0x23   : > { %v234_v10 = vld [vmem:[%s1256_s2 + $0x8] sm:$0xff]  ;;  %v236_v12 = vld [vmem:[%s1256_s2 + $0x18] sm:$0xff]  ;;  %v235_v13 = vld [vmem:[%s1256_s2 + $0x10] sm:$0xff]  ;;  %vm588_vm4 = vcmask 23568  }
  0x24   : > { %v238_v14 = vld [vmem:[%s1256_s2 + $0x28] sm:$0xff]  ;;  %v237_v15 = vld [vmem:[%s1256_s2 + $0x20] sm:$0xff]  ;;  %v240_v16 = vld [vmem:[%s1256_s2 + $0x38] sm:$0xff]  ;;  %v375_v42 = vsub.s32 1, %v1081_v39  ;;  %v283_v43 = vsub.s32 0, %v1081_v39  ;;  %v427_v47 = vsub.s32 2, %v1081_v39 }
  0x25   : > { %v239_v17 = vld [vmem:[%s1256_s2 + $0x30] sm:$0xff]  ;;  %v1086_v46 = vld [vmem:[%s1021_s11] sm:$0xf]  ;;  %v447_v52 = vsub.s32 3, %v1081_v39 }
  0x26   : > { %258 = vperm.xlu1 %813, %v228_v4   ;;  %248 = vperm.xlu0 %812, %v226_v5   ;;  %v1090_v48 = vrot.slane %v1086_v46, %v375_v42  ;;  %v284_v49 = vrot.slane %v1086_v46, %v283_v43  ;;  %v1097_v53 = vrot.slane %v1086_v46, %v427_v47 }
  0x27   : > { %v1104_v60 = vrot.slane %v1086_v46, %v447_v52 }
  0x2a   : > { %268 = vperm.xlu1 %813, %v230_v6   ;;  %263 = vperm.xlu0 %812, %v229_v7  }
  0x2e   : > { %278 = vperm.xlu1 %813, %v232_v8   ;;  %273 = vperm.xlu0 %812, %v231_v9  }
  0x32   : > { %300 = vperm.xlu1 %813, %v234_v10   ;;  %295 = vperm.xlu0 %812, %v233_v11  }
  0x36   : > { %310 = vperm.xlu1 %813, %v236_v12   ;;  %305 = vperm.xlu0 %812, %v235_v13  }
  0x3a   : > { %320 = vperm.xlu1 %813, %v238_v14   ;;  %315 = vperm.xlu0 %812, %v237_v15  }
  0x3e   : > { %330 = vperm.xlu1 %813, %v240_v16   ;;  %325 = vperm.xlu0 %812, %v239_v17  }
  0x42   : > { %815 = vset.pattern.permute.xlu1 %v916_v18  ;;  %814 = vset.pattern.permute.xlu0 %v916_v18 }
  0x43   : > { %346 = vperm.xlu1 %815, %v226_v5   ;;  %342 = vperm.xlu0 %814, %v225_v2  }
  0x47   : > { %350 = vperm.xlu1 %815, %v227_v1   ;;  %354 = vperm.xlu0 %814, %v228_v4  }
  0x4b   : > { %358 = vperm.xlu1 %815, %v229_v7   ;;  %362 = vperm.xlu0 %814, %v230_v6  }
  0x4f   : > { %366 = vperm.xlu1 %815, %v231_v9   ;;  %370 = vperm.xlu0 %814, %v232_v8  }
  0x53   : > { %816 = vset.pattern.permute.xlu1 %v917_v19  ;;  %817 = vset.pattern.permute.xlu0 %v917_v19 }
  0x54   : > { %394 = vperm.xlu1 %816, %v225_v2   ;;  %398 = vperm.xlu0 %817, %v226_v5  }
  0x58   : > { %402 = vperm.xlu1 %816, %v227_v1   ;;  %410 = vperm.xlu0 %817, %v229_v7  }
  0x5c   : > { %406 = vperm.xlu1 %816, %v228_v4   ;;  %418 = vperm.xlu0 %817, %v231_v9  }
  0x60   : > { %414 = vperm.xlu1 %816, %v230_v6  }
  0x64   : > { %422 = vperm.xlu1 %816, %v232_v8  }
  0xa1   : > { %v254_v20 = vpop.permute.xlu1 %253  ;;  %v244_v21 = vpop.permute.xlu0 %243 }
  0xa2   : > { %v285_v54 = vmul.f32 %v284_v49, %v244_v21  ;;  %v287_v61 = vmul.f32 %v284_v49, %v254_v20 }
  0xa5   : > { %v259_v22 = vpop.permute.xlu1 %258  ;;  %v249_v23 = vpop.permute.xlu0 %248 }
  0xa6   : > { %v286_v55 = vmul.f32 %v284_v49, %v249_v23  ;;  %v288_v9 = vmul.f32 %v284_v49, %v259_v22 }
  0xa9   : > { %v1073_v24 = vpop.permute.xlu1 %268  ;;  %v264_v25 = vpop.permute.xlu0 %263 }
  0xaa   : > { %v289_v62 = vmul.f32 %v284_v49, %v264_v25  ;;  %v290_v23 = vmul.f32 %v284_v49, %v1073_v24 }
  0xad   : > { %v1075_v26 = vpop.permute.xlu1 %278  ;;  %v274_v27 = vpop.permute.xlu0 %273 }
  0xae   : > { %v291_v10 = vmul.f32 %v284_v49, %v274_v27 }
  0xb1   : > { %v301_v28 = vpop.permute.xlu1 %300  ;;  %v296_v29 = vpop.permute.xlu0 %295 }
  0xb2   : > { %v334_v58 = vadd.f32 %v301_v28, %v286_v55  ;;  %v333_v59 = vadd.f32 %v296_v29, %v285_v54  ;;  %v292_v54 = vmul.f32 %v284_v49, %v1075_v26 }
  0xb5   : > { %v311_v30 = vpop.permute.xlu1 %310  ;;  %v306_v31 = vpop.permute.xlu0 %305 }
  0xb6   : > { %v335_v7 = vadd.f32 %v306_v31, %v287_v61  ;;  %v336_v25 = vadd.f32 %v311_v30, %v288_v9 }
  0xb9   : > { %v1077_v32 = vpop.permute.xlu1 %320  ;;  %v316_v33 = vpop.permute.xlu0 %315 }
  0xba   : > { %v337_v8 = vadd.f32 %v316_v33, %v289_v62  ;;  %v338_v43 = vadd.f32 %v1077_v32, %v290_v23 }
  0xbd   : > { %v1079_v34 = vpop.permute.xlu1 %330  ;;  %v326_v35 = vpop.permute.xlu0 %325 }
  0xbe   : > { %v339_v27 = vadd.f32 %v326_v35, %v291_v10  ;;  %v340_v61 = vadd.f32 %v1079_v34, %v292_v54 }
  0xc2   : > { %v347_v37 = vpop.permute.xlu1 %346  ;;  %v343_v38 = vpop.permute.xlu0 %342 }
  0xc3   : > { %v378_v56 = vmul.f32 %v1090_v48, %v347_v37  ;;  %v377_v57 = vmul.f32 %v1090_v48, %v343_v38 }
  0xc5   : > { %v386_v3 = vadd.f32 %v378_v56, %v334_v58  ;;  %v385_v4 = vadd.f32 %v377_v57, %v333_v59 }
  0xc6   : > { %v351_v40 = vpop.permute.xlu1 %350  ;;  %v355_v41 = vpop.permute.xlu0 %354 }
  0xc7   : > { %v379_v63 = vmul.f32 %v1090_v48, %v351_v40  ;;  %v380_v14 = vmul.f32 %v1090_v48, %v355_v41 }
  0xc9   : > { %v387_v13 = vadd.f32 %v379_v63, %v335_v7  ;;  %v388_v36 = vadd.f32 %v380_v14, %v336_v25 }
  0xca   : > { %v359_v44 = vpop.permute.xlu1 %358  ;;  %v363_v45 = vpop.permute.xlu0 %362 }
  0xcb   : > { %v381_v0 = vmul.f32 %v1090_v48, %v359_v44  ;;  %v382_v37 = vmul.f32 %v1090_v48, %v363_v45 }
  0xcd   : > { %v389_v15 = vadd.f32 %v381_v0, %v337_v8  ;;  %v390_v55 = vadd.f32 %v382_v37, %v338_v43  ;;  %v460_v37 = vld [vmem:[#allocation2 + $0x18] sm:$0xff] }
  0xce   : > { %v367_v50 = vpop.permute.xlu1 %366  ;;  %v1093_v51 = vpop.permute.xlu0 %370 }
  0xcf   : > { %v383_v16 = vmul.f32 %v1090_v48, %v367_v50  ;;  %v384_v57 = vmul.f32 %v1090_v48, %v1093_v51 }
  0xd1   : > { %v391_v38 = vadd.f32 %v383_v16, %v339_v27  ;;  %v461_v27 = vld [vmem:[#allocation2 + $0x20] sm:$0xff] }
  0xd3   : > { %v395_v1 = vpop.permute.xlu1 %394  ;;  %v399_v2 = vpop.permute.xlu0 %398 }
  0xd4   : > { %v429_v5 = vmul.f32 %v1097_v53, %v395_v1  ;;  %v430_v6 = vmul.f32 %v1097_v53, %v399_v2  ;;  %v392_v1 = vadd.f32 %v384_v57, %v340_v61 }
  0xd6   : > { %v437_v11 = vadd.f32 %v429_v5, %v385_v4  ;;  %v1110_v12 = vadd.f32 %v430_v6, %v386_v3 }
  0xd7   : > { %v403_v17 = vpop.permute.xlu1 %402  ;;  %v411_v18 = vpop.permute.xlu0 %410 }
  0xd8   : > { %v431_v19 = vmul.f32 %v1097_v53, %v403_v17  ;;  %v433_v20 = vmul.f32 %v1097_v53, %v411_v18  ;;  %v450_v21 = vmul.f32 %v1104_v60, %v1110_v12  ;;  %v449_v22 = vmul.f32 %v1104_v60, %v437_v11 }
  0xda   : > { %v439_v28 = vadd.f32 %v431_v19, %v387_v13  ;;  %v441_v29 = vadd.f32 %v433_v20, %v389_v15  ;;  %v469_v31 = vsel %vm465_vm0, %v450_v21, 0.0  ;;  %v466_v33 = vsel %vm465_vm0, %v449_v22, 0.0  ;;  %v458_v19 = vld [vmem:[#allocation2 + $0x8] sm:$0xff]  ;;  %v457_v20 = vld [vmem:[#allocation2] sm:$0xff] }
  0xdb   : > { %v407_v40 = vpop.permute.xlu1 %406  ;;  %v419_v41 = vpop.permute.xlu0 %418  ;;  %470 = vadd.xlane.f32.xlu1 %v469_v31  ;;  %467 = vadd.xlane.f32.xlu0 %v466_v33  ;;  %v515_v49 = vmul.f32 %v449_v22, %v437_v11  ;;  %v516_v9 = vmul.f32 %v450_v21, %v1110_v12  ;;  %v573_v12 = vsel %vm572_vm1, %v1086_v46, 0.0 }
  0xdc   : > { %v432_v42 = vmul.f32 %v1097_v53, %v407_v40  ;;  %v435_v24 = vmul.f32 %v1097_v53, %v419_v41  ;;  %v453_v30 = vmul.f32 %v1104_v60, %v441_v29  ;;  %v451_v35 = vmul.f32 %v1104_v60, %v439_v28 }
  0xdd   : > { %v523_v3 = vsel %vm465_vm0, %v515_v49, 0.0  ;;  %v526_v10 = vsel %vm465_vm0, %v516_v9, 0.0 }
  0xde   : > { %v440_v44 = vadd.f32 %v432_v42, %v388_v36  ;;  %v443_v47 = vadd.f32 %v435_v24, %v391_v38  ;;  %v478_v50 = vsel %vm465_vm0, %v453_v30, 0.0  ;;  %v472_v45 = vsel %vm465_vm0, %v451_v35, 0.0  ;;  %v463_v36 = vld [vmem:[#allocation2 + $0x30] sm:$0xff]  ;;  %v462_v24 = vld [vmem:[#allocation2 + $0x28] sm:$0xff] }
  0xdf   : > { %v415_v56 = vpop.permute.xlu1 %414  ;;  %479 = vadd.xlane.f32.xlu1 %v478_v50  ;;  %473 = vadd.xlane.f32.xlu0 %v472_v45  ;;  %v517_v34 = vmul.f32 %v451_v35, %v439_v28  ;;  %v519_v8 = vmul.f32 %v453_v30, %v441_v29  ;;  %v459_v28 = vld [vmem:[#allocation2 + $0x10] sm:$0xff]  ;;  %v464_v50 = vld [vmem:[#allocation2 + $0x38] sm:$0xff] }
  0xe0   : > { %v434_v58 = vmul.f32 %v1097_v53, %v415_v56  ;;  %v455_v59 = vmul.f32 %v1104_v60, %v443_v47  ;;  %v452_v32 = vmul.f32 %v1104_v60, %v440_v44 }
  0xe1   : > { %v529_v6 = vsel %vm465_vm0, %v517_v34, 0.0 }
  0xe2   : > { %v442_v62 = vadd.f32 %v434_v58, %v390_v55  ;;  %v484_v63 = vsel %vm465_vm0, %v455_v59, 0.0  ;;  %v475_v26 = vsel %vm465_vm0, %v452_v32, 0.0  ;;  %v521_v11 = vmul.f32 %v455_v59, %v443_v47 }
  0xe3   : > { %v423_v0 = vpop.permute.xlu1 %422  ;;  %485 = vadd.xlane.f32.xlu1 %v484_v63  ;;  %476 = vadd.xlane.f32.xlu0 %v475_v26  ;;  %v518_v13 = vmul.f32 %v452_v32, %v440_v44 }
  0xe4   : > { %v436_v48 = vmul.f32 %v1097_v53, %v423_v0  ;;  %v454_v51 = vmul.f32 %v1104_v60, %v442_v62  ;;  %v535_v53 = vsel %vm465_vm0, %v519_v8, 0.0 }
  0xe5   : > { %v532_v14 = vsel %vm465_vm0, %v518_v13, 0.0 }
  0xe6   : > { %v444_v2 = vadd.f32 %v436_v48, %v392_v1  ;;  %v481_v4 = vsel %vm465_vm0, %v454_v51, 0.0  ;;  %v520_v15 = vmul.f32 %v454_v51, %v442_v62 }
  0xe7   : > { %524 = vadd.xlane.f32.xlu1 %v523_v3  ;;  %482 = vadd.xlane.f32.xlu0 %v481_v4 }
  0xe8   : > { %v456_v5 = vmul.f32 %v1104_v60, %v444_v2  ;;  %v541_v60 = vsel %vm465_vm0, %v521_v11, 0.0  ;;  %v538_v16 = vsel %vm465_vm0, %v520_v15, 0.0 }
  0xea   : > { %v487_v7 = vsel %vm465_vm0, %v456_v5, 0.0  ;;  %v522_v17 = vmul.f32 %v456_v5, %v444_v2 }
  0xeb   : > { %530 = vadd.xlane.f32.xlu1 %v529_v6  ;;  %488 = vadd.xlane.f32.xlu0 %v487_v7 }
  0xec   : > { %v544_v18 = vsel %vm465_vm0, %v522_v17, 0.0 }
  0xef   : > { %536 = vadd.xlane.f32.xlu1 %v535_v53  ;;  %527 = vadd.xlane.f32.xlu0 %v526_v10 }
  0xf3   : > { %542 = vadd.xlane.f32.xlu1 %v541_v60  ;;  %533 = vadd.xlane.f32.xlu0 %v532_v14 }
  0xf7   : > { %574 = vadd.xlane.f32.xlu1 %v573_v12  ;;  %539 = vadd.xlane.f32.xlu0 %v538_v16 }
  0xfb   : > { %545 = vadd.xlane.f32.xlu0 %v544_v18 }
 0x168   : > { %v471_v21 = vpop.xlane.xlu1 %470  ;;  %v468_v22 = vpop.xlane.xlu0 %467 }
 0x169   : > { %v491_v23 = vadd.f32 %v471_v21, %v458_v19  ;;  %v490_v25 = vadd.f32 %v468_v22, %v457_v20 }
 0x16b   : > { %500 = vst.msk [vmem:[#allocation2 + $0x8] sm:$0xff] %vm498_vm2, %v491_v23  ;;  %499 = vst.msk [vmem:[#allocation2] sm:$0xff] %vm498_vm2, %v490_v25 }
 0x16c   : > { %v480_v46 = vpop.xlane.xlu1 %479  ;;  %v474_v29 = vpop.xlane.xlu0 %473 }
 0x16d   : > { %v494_v31 = vadd.f32 %v480_v46, %v461_v27  ;;  %v492_v33 = vadd.f32 %v474_v29, %v459_v28 }
 0x16f   : > { %503 = vst.msk [vmem:[#allocation2 + $0x20] sm:$0xff] %vm498_vm2, %v494_v31  ;;  %501 = vst.msk [vmem:[#allocation2 + $0x10] sm:$0xff] %vm498_vm2, %v492_v33 }
 0x170   : > { %v486_v38 = vpop.xlane.xlu1 %485  ;;  %v477_v40 = vpop.xlane.xlu0 %476 }
 0x171   : > { %v496_v41 = vadd.f32 %v486_v38, %v463_v36  ;;  %v493_v42 = vadd.f32 %v477_v40, %v460_v37 }
 0x172   : > { %v507_v35 = vld [vmem:[#allocation2] sm:$0xff]  ;;  %v508_v32 = vld [vmem:[#allocation2 + $0x8] sm:$0xff] }
 0x173   : > { %505 = vst.msk [vmem:[#allocation2 + $0x30] sm:$0xff] %vm498_vm2, %v496_v41  ;;  %502 = vst.msk [vmem:[#allocation2 + $0x18] sm:$0xff] %vm498_vm2, %v493_v42 }
 0x174   : > { %v525_v30 = vpop.xlane.xlu1 %524  ;;  %v483_v43 = vpop.xlane.xlu0 %482 }
 0x175   : > { %v547_v44 = vadd.f32 %v525_v30, %v507_v35  ;;  %v495_v47 = vadd.f32 %v483_v43, %v462_v24 }
 0x176   : > { %v509_v54 = vld [vmem:[#allocation2 + $0x10] sm:$0xff]  ;;  %v511_v58 = vld [vmem:[#allocation2 + $0x20] sm:$0xff] }
 0x177   : > { %556 = vst.msk [vmem:[#allocation2] sm:$0xff] %vm555_vm3, %v547_v44 }
 0x178   : > { %504 = vst.msk [vmem:[#allocation2 + $0x28] sm:$0xff] %vm498_vm2, %v495_v47  ;;  %v531_v45 = vpop.xlane.xlu1 %530  ;;  %v489_v55 = vpop.xlane.xlu0 %488 }
 0x179   : > { %v549_v56 = vadd.f32 %v531_v45, %v509_v54  ;;  %v497_v57 = vadd.f32 %v489_v55, %v464_v50 }
 0x17a   : > { %v513_v26 = vld [vmem:[#allocation2 + $0x30] sm:$0xff]  ;;  %v510_v0 = vld [vmem:[#allocation2 + $0x18] sm:$0xff] }
 0x17b   : > { %558 = vst.msk [vmem:[#allocation2 + $0x10] sm:$0xff] %vm555_vm3, %v549_v56 }
 0x17c   : > { %506 = vst.msk [vmem:[#allocation2 + $0x38] sm:$0xff] %vm498_vm2, %v497_v57  ;;  %v537_v59 = vpop.xlane.xlu1 %536  ;;  %v528_v61 = vpop.xlane.xlu0 %527 }
 0x17d   : > { %v551_v62 = vadd.f32 %v537_v59, %v511_v58  ;;  %v548_v63 = vadd.f32 %v528_v61, %v508_v32 }
 0x17e   : > { %v564_v34 = vld [vmem:[#allocation2] sm:$0xff] }
 0x17f   : > { %560 = vst.msk [vmem:[#allocation2 + $0x20] sm:$0xff] %vm555_vm3, %v551_v62  ;;  %557 = vst.msk [vmem:[#allocation2 + $0x8] sm:$0xff] %vm555_vm3, %v548_v63  ;;  %v512_v3 = vld [vmem:[#allocation2 + $0x28] sm:$0xff] }
 0x180   : > { %v543_v49 = vpop.xlane.xlu1 %542  ;;  %v534_v1 = vpop.xlane.xlu0 %533 }
 0x181   : > { %v553_v48 = vadd.f32 %v543_v49, %v513_v26  ;;  %v550_v51 = vadd.f32 %v534_v1, %v510_v0 }
 0x182   : > { %v566_v9 = vld [vmem:[#allocation2 + $0x10] sm:$0xff] }
 0x183   : > { %562 = vst.msk [vmem:[#allocation2 + $0x30] sm:$0xff] %vm555_vm3, %v553_v48  ;;  %559 = vst.msk [vmem:[#allocation2 + $0x18] sm:$0xff] %vm555_vm3, %v550_v51  ;;  %v514_v60 = vld [vmem:[#allocation2 + $0x38] sm:$0xff] }
 0x184   : > { %v575_v2 = vpop.xlane.xlu1 %574  ;;  %v540_v4 = vpop.xlane.xlu0 %539 }
 0x185   : > { %v579_v5 = vrot.slane %v575_v2, %v447_v52  ;;  %v552_v6 = vadd.f32 %v540_v4, %v512_v3 }
 0x186   : > { %v568_v7 = vld [vmem:[#allocation2 + $0x20] sm:$0xff]  ;;  %v565_v8 = vld [vmem:[#allocation2 + $0x8] sm:$0xff] }
 0x187   : > { %v580_v53 = vadd.f32 %v579_v5, %v564_v34  ;;  %v581_v10 = vadd.f32 %v579_v5, %v565_v8  ;;  %v582_v11 = vadd.f32 %v579_v5, %v566_v9  ;;  %v584_v13 = vadd.f32 %v579_v5, %v568_v7  ;;  %561 = vst.msk [vmem:[#allocation2 + $0x28] sm:$0xff] %vm555_vm3, %v552_v6 }
 0x188   : > { %v546_v14 = vpop.xlane.xlu0 %545 }
 0x189   : > { %589 = vst.msk [vmem:[#allocation2] sm:$0xff] %vm588_vm4, %v580_v53  ;;  %590 = vst.msk [vmem:[#allocation2 + $0x8] sm:$0xff] %vm588_vm4, %v581_v10  ;;  %v554_v39 = vadd.f32 %v546_v14, %v514_v60 }
 0x18a   : > { %591 = vst.msk [vmem:[#allocation2 + $0x10] sm:$0xff] %vm588_vm4, %v582_v11  ;;  %593 = vst.msk [vmem:[#allocation2 + $0x20] sm:$0xff] %vm588_vm4, %v584_v13  ;;  %v570_v52 = vld [vmem:[#allocation2 + $0x30] sm:$0xff]  ;;  %v567_v15 = vld [vmem:[#allocation2 + $0x18] sm:$0xff] }
 0x18b   : > { %v583_v12 = vadd.f32 %v579_v5, %v567_v15  ;;  %v586_v16 = vadd.f32 %v579_v5, %v570_v52  ;;  %563 = vst.msk [vmem:[#allocation2 + $0x38] sm:$0xff] %vm555_vm3, %v554_v39 }
 0x18d   : > { %592 = vst.msk [vmem:[#allocation2 + $0x18] sm:$0xff] %vm588_vm4, %v583_v12  ;;  %595 = vst.msk [vmem:[#allocation2 + $0x30] sm:$0xff] %vm588_vm4, %v586_v16 }
 0x18e   : > { %v569_v17 = vld [vmem:[#allocation2 + $0x28] sm:$0xff] }
 0x18f   : > { %v585_v18 = vadd.f32 %v579_v5, %v569_v17  ;;  %601 = sbr.rel (!%p597_p1) target bundleno = 414 (0x19e), region = 40 }
 0x190   : > { %v602_v21 = vld [vmem:[#allocation2] sm:$0xff] (%p597_p1)  ;;  %v603_v22 = vld [vmem:[#allocation2 + $0x8] sm:$0xff] (%p597_p1) }
 0x191   : > { %594 = vst.msk [vmem:[#allocation2 + $0x28] sm:$0xff] %vm588_vm4, %v585_v18  ;;  %v604_v23 = vld [vmem:[#allocation2 + $0x10] sm:$0xff] (%p597_p1)  ;;  %610 = vst [vmem:[%s1023_s20] sm:$0xff] (%p597_p1), %v602_v21  ;;  %v606_v27 = vld [vmem:[#allocation2 + $0x20] sm:$0xff] (%p597_p1) }
 0x192   : > { %v571_v19 = vld [vmem:[#allocation2 + $0x38] sm:$0xff]  ;;  %611 = vst [vmem:[%s1023_s20 + $0x8] sm:$0xff] (%p597_p1), %v603_v22  ;;  %612 = vst [vmem:[%s1023_s20 + $0x10] sm:$0xff] (%p597_p1), %v604_v23 }
 0x193   : > { %v587_v20 = vadd.f32 %v579_v5, %v571_v19  ;;  %614 = vst [vmem:[%s1023_s20 + $0x20] sm:$0xff] (%p597_p1), %v606_v27 }
 0x194   : > { %v605_v25 = vld [vmem:[#allocation2 + $0x18] sm:$0xff] (%p597_p1)  ;;  %v608_v46 = vld [vmem:[#allocation2 + $0x30] sm:$0xff] (%p597_p1) }
 0x195   : > { %596 = vst.msk [vmem:[#allocation2 + $0x38] sm:$0xff] %vm588_vm4, %v587_v20  ;;  %613 = vst [vmem:[%s1023_s20 + $0x18] sm:$0xff] (%p597_p1), %v605_v25 }
 0x196   : > { %616 = vst [vmem:[%s1023_s20 + $0x30] sm:$0xff] %v608_v46 }
 0x198   : > { %v607_v28 = vld [vmem:[#allocation2 + $0x28] sm:$0xff] }
 0x199   : > { %615 = vst [vmem:[%s1023_s20 + $0x28] sm:$0xff] %v607_v28 }
 0x19c   : > { %v609_v29 = vld [vmem:[#allocation2 + $0x38] sm:$0xff] }
 0x19d   : > { %617 = vst [vmem:[%s1023_s20 + $0x38] sm:$0xff] %v609_v29 }
 0x19e PF: > { %s734_s15 = sshll.u32 %s900_s16, 10  ;;  %s632_s26 = sshll.u32 %s1023_s20, 4  ;;  %s1198_s26 = int_to_ptr.vmem [resolvable:$true] %s632_s26 }
 0x19f   : > { %s1195_s21 = scalar_lea.hbm %s1257_s3, %s734_s15  ;;  %s1202_s27 = scalar_lea.sflag [#allocation4], %s196_s29 }
 0x1a0   : > { %s818_s4 = scalar_lea.vmem %s1198_s26, 1024  ;;  %s918_s16 = smov [#allocation3]  }
 0x1a1   : > { %p819_p2 = scmp.ne.s32.totalorder %s1198_s26, %s818_s4  ;;  %s822_s30 = sshll.u32 %s918_s16, 4  ;;  %s823_s30 = int_to_ptr.vmem [resolvable:$false] %s822_s30 }
 0x1a2   : > { %s824_s5 = scalar_lea.vmem %s823_s30, 2048  ;;  %p825_p6 = scmp.lt.s32.totalorder %s1198_s26, %s823_s30 }
 0x1a3   : > { %p820_p4 = pnand %p819_p2, %p990_p3  ;;  %p826_p7 = scmp.lt.s32.totalorder %s824_s5, %s818_s4 }
 0x1a5   : > { %p821_p5 = pneg %p820_p4  ;;  %p827_p8 = por %p826_p7, %p825_p6 }
 0x1a7   : > { %p828_p10 = pnand %p827_p8, %p821_p5 }
 0x1a9   : > { %831 = shalt.err (!%p828_p10)
}
 0x1aa   : > { %s832_s29 = scalar_lea.hbm %s1195_s21, 1024  ;;  %s836_s7 = scalar_lea.hbm %s1257_s3, 2048 }
 0x1ab   : > { %p833_p11 = scmp.ne.s32.totalorder %s1195_s21, %s832_s29  ;;  %p837_p0 = scmp.lt.u32.totalorder %s1195_s21, %s1257_s3 }
 0x1ac   : > { %p838_p1 = scmp.lt.u32.totalorder %s836_s7, %s832_s29  ;;  %p840_p4 = scmp.lt.u32.totalorder %s832_s29, %s1195_s21 }
 0x1ad   : > { %p834_p12 = pnand %p833_p11, %p990_p3 }
 0x1ae   : > { %p839_p2 = por %p838_p1, %p837_p0 }
 0x1af   : > { %p835_p13 = pneg %p834_p12 }
 0x1b0   : > { %p841_p5 = por %p840_p4, %p839_p2 }
 0x1b2   : > { %p842_p6 = pnand %p841_p5, %p835_p13 }
 0x1b4   : > { %845 = shalt.err (!%p842_p6)
}
 0x1b5   : > { %s919_s15 = smov 128   ;;  %s920_s11 = smov 8  }
 0x1b6   : > { %735 = dma.vmem_to_hbm [thread:$0]  (%p990_p3), %s1198_s26, 1024, %s1195_s21, %s1202_s27, %s919_s15, %s919_s15, %s920_s11  }
 0x1b7 PF: > { %p741_p7 = scmp.ge.s32.totalorder %s912_s19, 2  ;;  %s647_s10 = sand.u32 1, %s884_s12  }
 0x1b8   : > { %s648_s4 = scalar_lea.sflag [#allocation4], %s647_s10 }
 0x1b9   : > { %p738_p8 = pnand %p741_p7, %p1000_p9 }
 0x1bb   : > { %879 = dma.done.wait (!%p738_p8), %s648_s4, 1024  }
 0x1bc   : > { %881 = vsyncadd (!%p738_p8), %s648_s4, 4294966272  ;;  %s16_s19 = sadd.s32 1, %s912_s19   ;;  %s1260_s12 = smov %s888_s13 }
 0x1bd   : > { %p13_p10 = scmp.ge.s32.totalorder %s16_s19, 6   ;;  %s1261_s13 = smov %s892_s14 }
 0x1be   : > { %s1262_s14 = smov %s1008_s28  ;;  %s1263_s15 = smov %s904_s17 }
 0x1bf   : > { %s1264_s16 = smov %s908_s18  ;;  %s1265_s17 = smov %s1268_s22 }
 0x1c0   : > { %s1266_s18 = smov %s1272_s23  ;;  %15 = sbr.rel (!%p13_p10) target bundleno = 5 (0x5), region = 75 }
 0x1c7   :  { %653 = vsyncpa [#allocation4], 1 }
 0x1c8   :  { %655 = vsyncpa [#allocation4 + $0x1], 1 }

</bundles_post_ra>
